<compile_context>
chip_gen: v5e
topology: v5e:2x2
jax: 0.10.0
libtpu: 0.0.40
codegen_flags: <defaults>
</compile_context>

<pallas_src>
import jax
import jax.numpy as jnp
from jax import lax
from jax.experimental import pallas as pl
from jax.experimental.pallas import tpu as pltpu  # noqa: F401  (TPU backend)


def _full_spec(shape):
    # whole-array block, single grid point (grid = ())
    return pl.BlockSpec(shape, lambda: (0,) * len(shape))


def _leaky(v, slope):
    return jnp.where(v >= 0.0, v, slope * v)


# ----------------------------------------------------------------------------
# Fused kernel:
#   phase 1: single-layer GRU over T steps (time-major input), keep only h_T
#   phase 2: leaky_relu -> HypergraphConv x2 (PyG semantics, no attention)
#            -> Linear -> leaky_relu
# HypergraphConv (no attention): X' = D^{-1} H B^{-1} H^T (X Theta^T) + bias
#   D_i = node degree (row sum of H), B_e = hyperedge degree (col sum of H),
#   1/0 -> 0; propagation operator P is identical for both layers.
#
# Operand slabs:
#   gw_ref   (F_pad + H + 2, 3H): rows [0:F_pad]        = W_ih^T (zero-padded rows)
#                                 rows [F_pad:F_pad+H]  = W_hh^T (gates [r|z|n])
#                                 row  [F_pad+H]        = gi bias [b_r|b_z|b_in]
#                                 row  [F_pad+H+1]      = [0|0|b_hn]
#   head_ref (C + 1, 2C + R):     rows [0:C]: lanes [0:C]=w1^T, [C:2C]=w2^T,
#                                             [2C:2C+R]=wl^T
#                                 row  [C]  : lanes [0:C]=b1, [C:2C]=b2,
#                                             [2C:2C+R]=bl
# ----------------------------------------------------------------------------
def hgat_fused_kernel(xf_ref,      # (T*N, F_pad)  time-major, lane-padded input
                      gw_ref,      # (F_pad+H+2, 3H) GRU slab
                      inc_ref,     # (N, M) dense incidence
                      head_ref,    # (C+1, 2C+R) head slab
                      out_ref):    # (N, R)
    N, R = out_ref.shape
    TN, F_pad = xf_ref.shape
    T = TN // N
    H = gw_ref.shape[1] // 3
    C = H                                             # c_in == c_out == GRU hidden

    # ---------------- phase 1: GRU, final hidden state only -----------------
    wih = gw_ref[0:F_pad, :]                          # (F_pad, 3H)  sublane-aligned
    whh = gw_ref[F_pad:F_pad + H, :]                  # (H, 3H)      sublane-aligned
    gi_bias = gw_ref[F_pad + H:F_pad + H + 1, :]      # (1, 3H)
    bhn_row = gw_ref[F_pad + H + 1:F_pad + H + 2, :]  # (1, 3H), only n-lanes nonzero

    # single fused input projection (h-independent, off the serial chain)
    xf = xf_ref[...]                                  # (T*N, F_pad)
    gi = jnp.dot(xf, wih, preferred_element_type=jnp.float32) + gi_bias   # (T*N, 3H)

    bhn = jnp.broadcast_to(bhn_row, (N, 3 * H))       # broadcast hoisted out of loop

    h = jnp.zeros((N, H), jnp.float32)
    # Fully unrolled recurrence (T static); one fused MXU push per step, row
    # slices static and sublane-aligned (N == 8), gate slices are lane slices.
    for t in range(T):
        lo = t * N
        gh = jnp.dot(h, whh, preferred_element_type=jnp.float32) + bhn    # (N, 3H)
        git = gi[lo:lo + N, :]
        rz = jax.nn.sigmoid(git[:, 0:2 * H] + gh[:, 0:2 * H])             # (N, 2H)
        r = rz[:, 0:H]
        z = rz[:, H:2 * H]
        n = jnp.tanh(git[:, 2 * H:3 * H] + r * gh[:, 2 * H:3 * H])
        h = (1.0 - z) * n + z * h

    o = _leaky(h, 0.01)                               # output = F.leaky_relu(h_T)

    # ---------------- phase 2: hypergraph head -------------------------------
    inc = inc_ref[...]                                # (N, M)
    dsum = jnp.sum(inc, axis=1, keepdims=True)        # (N, 1) node degree
    dinv = jnp.where(dsum > 0.0, 1.0 / dsum, 0.0)
    bsum = jnp.sum(inc, axis=0, keepdims=True)        # (1, M) hyperedge degree
    binv = jnp.where(bsum > 0.0, 1.0 / bsum, 0.0)
    # P = (D^-1 H) @ (B^-1 H^T): contract both operands over the edge axis
    # (rhs-transposed contraction, so inc.T is never materialized / DMA'd).
    prop = lax.dot_general(dinv * inc, binv * inc,
                           dimension_numbers=(((1,), (1,)), ((), ())),
                           preferred_element_type=jnp.float32)   # (N, N)

    w1t = head_ref[0:C, 0:C]
    w2t = head_ref[0:C, C:2 * C]
    wlt = head_ref[0:C, 2 * C:2 * C + R]
    b1 = head_ref[C:C + 1, 0:C]
    b2 = head_ref[C:C + 1, C:2 * C]
    bl = head_ref[C:C + 1, 2 * C:2 * C + R]

    def hyperconv(x, w_t, bias):
        z = jnp.dot(x, w_t, preferred_element_type=jnp.float32)      # X Theta^T
        return jnp.dot(prop, z, preferred_element_type=jnp.float32) + bias

    x = _leaky(hyperconv(o, w1t, b1), 0.2)            # hatt1 + leaky(0.2)
    x = _leaky(hyperconv(x, w2t, b2), 0.2)            # hatt2 + leaky(0.2)
    y = jnp.dot(x, wlt, preferred_element_type=jnp.float32) + bl
    out_ref[...] = _leaky(y, 0.01)                    # leaky(linear1(x))


# ----------------------------------------------------------------------------
# Full forward (default HGAT config)
# ----------------------------------------------------------------------------
def hgat_forward(price_nt6, node_idx, edge_idx, num_edges, params):
    N, T, F_in = price_nt6.shape
    C = params["w_hh"].shape[1]
    R = params["wl"].shape[0]
    F_pad = 8                                         # sublane-aligned feature width

    # time-major flattened sequence: rows [t*N:(t+1)*N] are all nodes at time t
    xf = jnp.transpose(price_nt6, (1, 0, 2)).reshape(T * N, F_in)
    xf_pad = jnp.pad(xf, ((0, 0), (0, F_pad - F_in)))

    # dense incidence; scatter-add so repeated (node, edge) pairs count like
    # PyG's scatter-based degrees. num_edges is static (no host sync).
    inc = jnp.zeros((N, num_edges), jnp.float32).at[node_idx, edge_idx].add(1.0)

    # GRU slab (PyTorch layout: W_ih (3C, F_in), W_hh (3C, C), rows [r;z;n])
    wih, whh = params["w_ih"], params["w_hh"]
    bih, bhh = params["b_ih"], params["b_hh"]
    wih_pad = jnp.pad(wih.T, ((0, F_pad - F_in), (0, 0)))              # (F_pad, 3C)
    gi_bias = jnp.concatenate([bih[0:2 * C] + bhh[0:2 * C],
                               bih[2 * C:3 * C]]).reshape(1, 3 * C)    # [b_r|b_z|b_in]
    bhn_row = jnp.concatenate([jnp.zeros((2 * C,), jnp.float32),
                               bhh[2 * C:3 * C]]).reshape(1, 3 * C)    # [0|0|b_hn]
    gru_slab = jnp.concatenate([wih_pad, whh.T, gi_bias, bhn_row], axis=0)

    # head slab: w1^T | w2^T | wl^T over rows 0:C, biases in row C
    w_row = jnp.concatenate([params["w1"].T, params["w2"].T, params["wl"].T], axis=1)
    b_row = jnp.concatenate([params["b1"], params["b2"], params["bl"]]).reshape(1, 2 * C + R)
    head_slab = jnp.concatenate([w_row, b_row], axis=0)               # (C+1, 2C+R)

    args = (xf_pad, gru_slab, inc, head_slab)

    return pl.pallas_call(
        hgat_fused_kernel,
        out_shape=jax.ShapeDtypeStruct((N, R), jnp.float32),
        in_specs=[_full_spec(a.shape) for a in args],
        out_specs=_full_spec((N, R)),
    )(*args)


if __name__ == "__main__":
    key = jax.random.PRNGKey(0)
    N, T, F_IN = 8, 8, 6        # nodes (stocks), seq_len, GRU input_size
    C = 32                      # c_in == c_out hidden width
    R = 4                       # len(rr_num)
    M = 3                       # number of hyperedges (static)

    ks = jax.random.split(key, 12)
    price_input = jax.random.normal(ks[0], (N, T, F_IN), jnp.float32)

    params = {
        # GRU (PyTorch layout: W_ih (3H, F_in), W_hh (3H, H), biases (3H,))
        "w_ih": jax.random.normal(ks[1], (3 * C, F_IN), jnp.float32) * 0.1,
        "w_hh": jax.random.normal(ks[2], (3 * C, C), jnp.float32) * 0.1,
        "b_ih": jax.random.normal(ks[3], (3 * C,), jnp.float32) * 0.1,
        "b_hh": jax.random.normal(ks[4], (3 * C,), jnp.float32) * 0.1,
        # hatt1 / hatt2 (HypergraphConv, use_attention=False -> heads=1)
        "w1": jax.random.normal(ks[5], (C, C), jnp.float32) * 0.1,
        "b1": jax.random.normal(ks[6], (C,), jnp.float32) * 0.1,
        "w2": jax.random.normal(ks[7], (C, C), jnp.float32) * 0.1,
        "b2": jax.random.normal(ks[8], (C,), jnp.float32) * 0.1,
        # linear1: (len(rr_num), c_in)
        "wl": jax.random.normal(ks[9], (R, C), jnp.float32) * 0.1,
        "bl": jax.random.normal(ks[10], (R,), jnp.float32) * 0.1,
    }

    # hyperedge index e = [node indices; hyperedge indices]
    node_idx = jnp.array([0, 1, 2, 3, 4, 5, 6, 7, 0, 5], jnp.int32)
    edge_idx = jnp.array([0, 0, 0, 1, 1, 1, 2, 2, 2, 2], jnp.int32)

    out = hgat_forward(price_input, node_idx, edge_idx, M, params)
    out = jax.block_until_ready(out)
    assert out.shape == (N, R) and out.dtype == jnp.float32
    print("KERNEL_OK")
</pallas_src>

<mosaic_0001>
module attributes {stable_mosaic.version = 11 : i64} {
  func.func @hgat_fused_kernel(%arg0: memref<64x8xf32, #tpu.memory_space<vmem>>, %arg1: memref<42x96xf32, #tpu.memory_space<vmem>>, %arg2: memref<8x3xf32, #tpu.memory_space<vmem>>, %arg3: memref<33x68xf32, #tpu.memory_space<vmem>>, %arg4: memref<8x4xf32, #tpu.memory_space<vmem>>) attributes {dimension_semantics = [], scalar_prefetch = 0 : i64, scratch_operands = 0 : i64, tpu.core_type = #tpu.core_type<tc>} {
    %c0 = arith.constant 0 : index
    %c0_0 = arith.constant 0 : index
    %0 = vector.load %arg1[%c0, %c0_0] : memref<42x96xf32, #tpu.memory_space<vmem>>, vector<8x96xf32>
    %c8 = arith.constant 8 : index
    %c0_1 = arith.constant 0 : index
    %1 = vector.load %arg1[%c8, %c0_1] : memref<42x96xf32, #tpu.memory_space<vmem>>, vector<32x96xf32>
    %c40 = arith.constant 40 : index
    %c0_2 = arith.constant 0 : index
    %2 = vector.load %arg1[%c40, %c0_2] : memref<42x96xf32, #tpu.memory_space<vmem>>, vector<1x96xf32>
    %c41 = arith.constant 41 : index
    %c0_3 = arith.constant 0 : index
    %3 = vector.load %arg1[%c41, %c0_3] : memref<42x96xf32, #tpu.memory_space<vmem>>, vector<1x96xf32>
    %c0_4 = arith.constant 0 : index
    %c0_5 = arith.constant 0 : index
    %4 = vector.load %arg0[%c0_4, %c0_5] : memref<64x8xf32, #tpu.memory_space<vmem>>, vector<64x8xf32>
    %cst = arith.constant dense<0.000000e+00> : vector<64x96xf32>
    %5 = tpu.matmul %4, %0, %cst {dimension_numbers = #tpu.dot_dimension_numbers<[1], [0], [0], [1], [0, 0, 1, 1], [], []>} : vector<64x8xf32>, vector<8x96xf32>, vector<64x96xf32> -> vector<64x96xf32>
    %6 = vector.broadcast %2 : vector<1x96xf32> to vector<64x96xf32>
    %7 = arith.addf %5, %6 : vector<64x96xf32>
    %8 = vector.shape_cast %3 : vector<1x96xf32> to vector<1x96xf32>
    %9 = vector.broadcast %8 : vector<1x96xf32> to vector<8x96xf32>
    %cst_6 = arith.constant 0.000000e+00 : f32
    %10 = vector.broadcast %cst_6 : f32 to vector<8x32xf32>
    %cst_7 = arith.constant dense<0.000000e+00> : vector<8x96xf32>
    %11 = tpu.matmul %10, %1, %cst_7 {dimension_numbers = #tpu.dot_dimension_numbers<[1], [0], [0], [1], [0, 0, 1, 1], [], []>} : vector<8x32xf32>, vector<32x96xf32>, vector<8x96xf32> -> vector<8x96xf32>
    %12 = arith.addf %11, %9 : vector<8x96xf32>
    %13 = vector.extract_strided_slice %7 {offsets = [0, 0], sizes = [8, 96], strides = [1, 1]} : vector<64x96xf32> to vector<8x96xf32>
    %14 = vector.extract_strided_slice %13 {offsets = [0, 0], sizes = [8, 64], strides = [1, 1]} : vector<8x96xf32> to vector<8x64xf32>
    %15 = vector.extract_strided_slice %12 {offsets = [0, 0], sizes = [8, 64], strides = [1, 1]} : vector<8x96xf32> to vector<8x64xf32>
    %16 = arith.addf %14, %15 : vector<8x64xf32>
    %17 = arith.negf %16 : vector<8x64xf32>
    %18 = math.exp %17 : vector<8x64xf32>
    %cst_8 = arith.constant 1.000000e+00 : f32
    %19 = vector.broadcast %cst_8 : f32 to vector<8x64xf32>
    %20 = arith.addf %19, %18 : vector<8x64xf32>
    %21 = arith.divf %19, %20 : vector<8x64xf32>
    %22 = vector.extract_strided_slice %21 {offsets = [0, 0], sizes = [8, 32], strides = [1, 1]} : vector<8x64xf32> to vector<8x32xf32>
    %23 = vector.extract_strided_slice %21 {offsets = [0, 32], sizes = [8, 32], strides = [1, 1]} : vector<8x64xf32> to vector<8x32xf32>
    %24 = vector.extract_strided_slice %13 {offsets = [0, 64], sizes = [8, 32], strides = [1, 1]} : vector<8x96xf32> to vector<8x32xf32>
    %25 = vector.extract_strided_slice %12 {offsets = [0, 64], sizes = [8, 32], strides = [1, 1]} : vector<8x96xf32> to vector<8x32xf32>
    %26 = arith.mulf %22, %25 : vector<8x32xf32>
    %27 = arith.addf %24, %26 : vector<8x32xf32>
    %28 = math.tanh %27 : vector<8x32xf32>
    %cst_9 = arith.constant 1.000000e+00 : f32
    %29 = vector.broadcast %cst_9 : f32 to vector<8x32xf32>
    %30 = arith.subf %29, %23 : vector<8x32xf32>
    %31 = arith.mulf %30, %28 : vector<8x32xf32>
    %32 = arith.mulf %23, %10 : vector<8x32xf32>
    %33 = arith.addf %31, %32 : vector<8x32xf32>
    %cst_10 = arith.constant dense<0.000000e+00> : vector<8x96xf32>
    %34 = tpu.matmul %33, %1, %cst_10 {dimension_numbers = #tpu.dot_dimension_numbers<[1], [0], [0], [1], [0, 0, 1, 1], [], []>} : vector<8x32xf32>, vector<32x96xf32>, vector<8x96xf32> -> vector<8x96xf32>
    %35 = arith.addf %34, %9 : vector<8x96xf32>
    %36 = vector.extract_strided_slice %7 {offsets = [8, 0], sizes = [8, 96], strides = [1, 1]} : vector<64x96xf32> to vector<8x96xf32>
    %37 = vector.extract_strided_slice %36 {offsets = [0, 0], sizes = [8, 64], strides = [1, 1]} : vector<8x96xf32> to vector<8x64xf32>
    %38 = vector.extract_strided_slice %35 {offsets = [0, 0], sizes = [8, 64], strides = [1, 1]} : vector<8x96xf32> to vector<8x64xf32>
    %39 = arith.addf %37, %38 : vector<8x64xf32>
    %40 = arith.negf %39 : vector<8x64xf32>
    %41 = math.exp %40 : vector<8x64xf32>
    %cst_11 = arith.constant 1.000000e+00 : f32
    %42 = vector.broadcast %cst_11 : f32 to vector<8x64xf32>
    %43 = arith.addf %42, %41 : vector<8x64xf32>
    %44 = arith.divf %42, %43 : vector<8x64xf32>
    %45 = vector.extract_strided_slice %44 {offsets = [0, 0], sizes = [8, 32], strides = [1, 1]} : vector<8x64xf32> to vector<8x32xf32>
    %46 = vector.extract_strided_slice %44 {offsets = [0, 32], sizes = [8, 32], strides = [1, 1]} : vector<8x64xf32> to vector<8x32xf32>
    %47 = vector.extract_strided_slice %36 {offsets = [0, 64], sizes = [8, 32], strides = [1, 1]} : vector<8x96xf32> to vector<8x32xf32>
    %48 = vector.extract_strided_slice %35 {offsets = [0, 64], sizes = [8, 32], strides = [1, 1]} : vector<8x96xf32> to vector<8x32xf32>
    %49 = arith.mulf %45, %48 : vector<8x32xf32>
    %50 = arith.addf %47, %49 : vector<8x32xf32>
    %51 = math.tanh %50 : vector<8x32xf32>
    %cst_12 = arith.constant 1.000000e+00 : f32
    %52 = vector.broadcast %cst_12 : f32 to vector<8x32xf32>
    %53 = arith.subf %52, %46 : vector<8x32xf32>
    %54 = arith.mulf %53, %51 : vector<8x32xf32>
    %55 = arith.mulf %46, %33 : vector<8x32xf32>
    %56 = arith.addf %54, %55 : vector<8x32xf32>
    %cst_13 = arith.constant dense<0.000000e+00> : vector<8x96xf32>
    %57 = tpu.matmul %56, %1, %cst_13 {dimension_numbers = #tpu.dot_dimension_numbers<[1], [0], [0], [1], [0, 0, 1, 1], [], []>} : vector<8x32xf32>, vector<32x96xf32>, vector<8x96xf32> -> vector<8x96xf32>
    %58 = arith.addf %57, %9 : vector<8x96xf32>
    %59 = vector.extract_strided_slice %7 {offsets = [16, 0], sizes = [8, 96], strides = [1, 1]} : vector<64x96xf32> to vector<8x96xf32>
    %60 = vector.extract_strided_slice %59 {offsets = [0, 0], sizes = [8, 64], strides = [1, 1]} : vector<8x96xf32> to vector<8x64xf32>
    %61 = vector.extract_strided_slice %58 {offsets = [0, 0], sizes = [8, 64], strides = [1, 1]} : vector<8x96xf32> to vector<8x64xf32>
    %62 = arith.addf %60, %61 : vector<8x64xf32>
    %63 = arith.negf %62 : vector<8x64xf32>
    %64 = math.exp %63 : vector<8x64xf32>
    %cst_14 = arith.constant 1.000000e+00 : f32
    %65 = vector.broadcast %cst_14 : f32 to vector<8x64xf32>
    %66 = arith.addf %65, %64 : vector<8x64xf32>
    %67 = arith.divf %65, %66 : vector<8x64xf32>
    %68 = vector.extract_strided_slice %67 {offsets = [0, 0], sizes = [8, 32], strides = [1, 1]} : vector<8x64xf32> to vector<8x32xf32>
    %69 = vector.extract_strided_slice %67 {offsets = [0, 32], sizes = [8, 32], strides = [1, 1]} : vector<8x64xf32> to vector<8x32xf32>
    %70 = vector.extract_strided_slice %59 {offsets = [0, 64], sizes = [8, 32], strides = [1, 1]} : vector<8x96xf32> to vector<8x32xf32>
    %71 = vector.extract_strided_slice %58 {offsets = [0, 64], sizes = [8, 32], strides = [1, 1]} : vector<8x96xf32> to vector<8x32xf32>
    %72 = arith.mulf %68, %71 : vector<8x32xf32>
    %73 = arith.addf %70, %72 : vector<8x32xf32>
    %74 = math.tanh %73 : vector<8x32xf32>
    %cst_15 = arith.constant 1.000000e+00 : f32
    %75 = vector.broadcast %cst_15 : f32 to vector<8x32xf32>
    %76 = arith.subf %75, %69 : vector<8x32xf32>
    %77 = arith.mulf %76, %74 : vector<8x32xf32>
    %78 = arith.mulf %69, %56 : vector<8x32xf32>
    %79 = arith.addf %77, %78 : vector<8x32xf32>
    %cst_16 = arith.constant dense<0.000000e+00> : vector<8x96xf32>
    %80 = tpu.matmul %79, %1, %cst_16 {dimension_numbers = #tpu.dot_dimension_numbers<[1], [0], [0], [1], [0, 0, 1, 1], [], []>} : vector<8x32xf32>, vector<32x96xf32>, vector<8x96xf32> -> vector<8x96xf32>
    %81 = arith.addf %80, %9 : vector<8x96xf32>
    %82 = vector.extract_strided_slice %7 {offsets = [24, 0], sizes = [8, 96], strides = [1, 1]} : vector<64x96xf32> to vector<8x96xf32>
    %83 = vector.extract_strided_slice %82 {offsets = [0, 0], sizes = [8, 64], strides = [1, 1]} : vector<8x96xf32> to vector<8x64xf32>
    %84 = vector.extract_strided_slice %81 {offsets = [0, 0], sizes = [8, 64], strides = [1, 1]} : vector<8x96xf32> to vector<8x64xf32>
    %85 = arith.addf %83, %84 : vector<8x64xf32>
    %86 = arith.negf %85 : vector<8x64xf32>
    %87 = math.exp %86 : vector<8x64xf32>
    %cst_17 = arith.constant 1.000000e+00 : f32
    %88 = vector.broadcast %cst_17 : f32 to vector<8x64xf32>
    %89 = arith.addf %88, %87 : vector<8x64xf32>
    %90 = arith.divf %88, %89 : vector<8x64xf32>
    %91 = vector.extract_strided_slice %90 {offsets = [0, 0], sizes = [8, 32], strides = [1, 1]} : vector<8x64xf32> to vector<8x32xf32>
    %92 = vector.extract_strided_slice %90 {offsets = [0, 32], sizes = [8, 32], strides = [1, 1]} : vector<8x64xf32> to vector<8x32xf32>
    %93 = vector.extract_strided_slice %82 {offsets = [0, 64], sizes = [8, 32], strides = [1, 1]} : vector<8x96xf32> to vector<8x32xf32>
    %94 = vector.extract_strided_slice %81 {offsets = [0, 64], sizes = [8, 32], strides = [1, 1]} : vector<8x96xf32> to vector<8x32xf32>
    %95 = arith.mulf %91, %94 : vector<8x32xf32>
    %96 = arith.addf %93, %95 : vector<8x32xf32>
    %97 = math.tanh %96 : vector<8x32xf32>
    %cst_18 = arith.constant 1.000000e+00 : f32
    %98 = vector.broadcast %cst_18 : f32 to vector<8x32xf32>
    %99 = arith.subf %98, %92 : vector<8x32xf32>
    %100 = arith.mulf %99, %97 : vector<8x32xf32>
    %101 = arith.mulf %92, %79 : vector<8x32xf32>
    %102 = arith.addf %100, %101 : vector<8x32xf32>
    %cst_19 = arith.constant dense<0.000000e+00> : vector<8x96xf32>
    %103 = tpu.matmul %102, %1, %cst_19 {dimension_numbers = #tpu.dot_dimension_numbers<[1], [0], [0], [1], [0, 0, 1, 1], [], []>} : vector<8x32xf32>, vector<32x96xf32>, vector<8x96xf32> -> vector<8x96xf32>
    %104 = arith.addf %103, %9 : vector<8x96xf32>
    %105 = vector.extract_strided_slice %7 {offsets = [32, 0], sizes = [8, 96], strides = [1, 1]} : vector<64x96xf32> to vector<8x96xf32>
    %106 = vector.extract_strided_slice %105 {offsets = [0, 0], sizes = [8, 64], strides = [1, 1]} : vector<8x96xf32> to vector<8x64xf32>
    %107 = vector.extract_strided_slice %104 {offsets = [0, 0], sizes = [8, 64], strides = [1, 1]} : vector<8x96xf32> to vector<8x64xf32>
    %108 = arith.addf %106, %107 : vector<8x64xf32>
    %109 = arith.negf %108 : vector<8x64xf32>
    %110 = math.exp %109 : vector<8x64xf32>
    %cst_20 = arith.constant 1.000000e+00 : f32
    %111 = vector.broadcast %cst_20 : f32 to vector<8x64xf32>
    %112 = arith.addf %111, %110 : vector<8x64xf32>
    %113 = arith.divf %111, %112 : vector<8x64xf32>
    %114 = vector.extract_strided_slice %113 {offsets = [0, 0], sizes = [8, 32], strides = [1, 1]} : vector<8x64xf32> to vector<8x32xf32>
    %115 = vector.extract_strided_slice %113 {offsets = [0, 32], sizes = [8, 32], strides = [1, 1]} : vector<8x64xf32> to vector<8x32xf32>
    %116 = vector.extract_strided_slice %105 {offsets = [0, 64], sizes = [8, 32], strides = [1, 1]} : vector<8x96xf32> to vector<8x32xf32>
    %117 = vector.extract_strided_slice %104 {offsets = [0, 64], sizes = [8, 32], strides = [1, 1]} : vector<8x96xf32> to vector<8x32xf32>
    %118 = arith.mulf %114, %117 : vector<8x32xf32>
    %119 = arith.addf %116, %118 : vector<8x32xf32>
    %120 = math.tanh %119 : vector<8x32xf32>
    %cst_21 = arith.constant 1.000000e+00 : f32
    %121 = vector.broadcast %cst_21 : f32 to vector<8x32xf32>
    %122 = arith.subf %121, %115 : vector<8x32xf32>
    %123 = arith.mulf %122, %120 : vector<8x32xf32>
    %124 = arith.mulf %115, %102 : vector<8x32xf32>
    %125 = arith.addf %123, %124 : vector<8x32xf32>
    %cst_22 = arith.constant dense<0.000000e+00> : vector<8x96xf32>
    %126 = tpu.matmul %125, %1, %cst_22 {dimension_numbers = #tpu.dot_dimension_numbers<[1], [0], [0], [1], [0, 0, 1, 1], [], []>} : vector<8x32xf32>, vector<32x96xf32>, vector<8x96xf32> -> vector<8x96xf32>
    %127 = arith.addf %126, %9 : vector<8x96xf32>
    %128 = vector.extract_strided_slice %7 {offsets = [40, 0], sizes = [8, 96], strides = [1, 1]} : vector<64x96xf32> to vector<8x96xf32>
    %129 = vector.extract_strided_slice %128 {offsets = [0, 0], sizes = [8, 64], strides = [1, 1]} : vector<8x96xf32> to vector<8x64xf32>
    %130 = vector.extract_strided_slice %127 {offsets = [0, 0], sizes = [8, 64], strides = [1, 1]} : vector<8x96xf32> to vector<8x64xf32>
    %131 = arith.addf %129, %130 : vector<8x64xf32>
    %132 = arith.negf %131 : vector<8x64xf32>
    %133 = math.exp %132 : vector<8x64xf32>
    %cst_23 = arith.constant 1.000000e+00 : f32
    %134 = vector.broadcast %cst_23 : f32 to vector<8x64xf32>
    %135 = arith.addf %134, %133 : vector<8x64xf32>
    %136 = arith.divf %134, %135 : vector<8x64xf32>
    %137 = vector.extract_strided_slice %136 {offsets = [0, 0], sizes = [8, 32], strides = [1, 1]} : vector<8x64xf32> to vector<8x32xf32>
    %138 = vector.extract_strided_slice %136 {offsets = [0, 32], sizes = [8, 32], strides = [1, 1]} : vector<8x64xf32> to vector<8x32xf32>
    %139 = vector.extract_strided_slice %128 {offsets = [0, 64], sizes = [8, 32], strides = [1, 1]} : vector<8x96xf32> to vector<8x32xf32>
    %140 = vector.extract_strided_slice %127 {offsets = [0, 64], sizes = [8, 32], strides = [1, 1]} : vector<8x96xf32> to vector<8x32xf32>
    %141 = arith.mulf %137, %140 : vector<8x32xf32>
    %142 = arith.addf %139, %141 : vector<8x32xf32>
    %143 = math.tanh %142 : vector<8x32xf32>
    %cst_24 = arith.constant 1.000000e+00 : f32
    %144 = vector.broadcast %cst_24 : f32 to vector<8x32xf32>
    %145 = arith.subf %144, %138 : vector<8x32xf32>
    %146 = arith.mulf %145, %143 : vector<8x32xf32>
    %147 = arith.mulf %138, %125 : vector<8x32xf32>
    %148 = arith.addf %146, %147 : vector<8x32xf32>
    %cst_25 = arith.constant dense<0.000000e+00> : vector<8x96xf32>
    %149 = tpu.matmul %148, %1, %cst_25 {dimension_numbers = #tpu.dot_dimension_numbers<[1], [0], [0], [1], [0, 0, 1, 1], [], []>} : vector<8x32xf32>, vector<32x96xf32>, vector<8x96xf32> -> vector<8x96xf32>
    %150 = arith.addf %149, %9 : vector<8x96xf32>
    %151 = vector.extract_strided_slice %7 {offsets = [48, 0], sizes = [8, 96], strides = [1, 1]} : vector<64x96xf32> to vector<8x96xf32>
    %152 = vector.extract_strided_slice %151 {offsets = [0, 0], sizes = [8, 64], strides = [1, 1]} : vector<8x96xf32> to vector<8x64xf32>
    %153 = vector.extract_strided_slice %150 {offsets = [0, 0], sizes = [8, 64], strides = [1, 1]} : vector<8x96xf32> to vector<8x64xf32>
    %154 = arith.addf %152, %153 : vector<8x64xf32>
    %155 = arith.negf %154 : vector<8x64xf32>
    %156 = math.exp %155 : vector<8x64xf32>
    %cst_26 = arith.constant 1.000000e+00 : f32
    %157 = vector.broadcast %cst_26 : f32 to vector<8x64xf32>
    %158 = arith.addf %157, %156 : vector<8x64xf32>
    %159 = arith.divf %157, %158 : vector<8x64xf32>
    %160 = vector.extract_strided_slice %159 {offsets = [0, 0], sizes = [8, 32], strides = [1, 1]} : vector<8x64xf32> to vector<8x32xf32>
    %161 = vector.extract_strided_slice %159 {offsets = [0, 32], sizes = [8, 32], strides = [1, 1]} : vector<8x64xf32> to vector<8x32xf32>
    %162 = vector.extract_strided_slice %151 {offsets = [0, 64], sizes = [8, 32], strides = [1, 1]} : vector<8x96xf32> to vector<8x32xf32>
    %163 = vector.extract_strided_slice %150 {offsets = [0, 64], sizes = [8, 32], strides = [1, 1]} : vector<8x96xf32> to vector<8x32xf32>
    %164 = arith.mulf %160, %163 : vector<8x32xf32>
    %165 = arith.addf %162, %164 : vector<8x32xf32>
    %166 = math.tanh %165 : vector<8x32xf32>
    %cst_27 = arith.constant 1.000000e+00 : f32
    %167 = vector.broadcast %cst_27 : f32 to vector<8x32xf32>
    %168 = arith.subf %167, %161 : vector<8x32xf32>
    %169 = arith.mulf %168, %166 : vector<8x32xf32>
    %170 = arith.mulf %161, %148 : vector<8x32xf32>
    %171 = arith.addf %169, %170 : vector<8x32xf32>
    %cst_28 = arith.constant dense<0.000000e+00> : vector<8x96xf32>
    %172 = tpu.matmul %171, %1, %cst_28 {dimension_numbers = #tpu.dot_dimension_numbers<[1], [0], [0], [1], [0, 0, 1, 1], [], []>} : vector<8x32xf32>, vector<32x96xf32>, vector<8x96xf32> -> vector<8x96xf32>
    %173 = arith.addf %172, %9 : vector<8x96xf32>
    %174 = vector.extract_strided_slice %7 {offsets = [56, 0], sizes = [8, 96], strides = [1, 1]} : vector<64x96xf32> to vector<8x96xf32>
    %175 = vector.extract_strided_slice %174 {offsets = [0, 0], sizes = [8, 64], strides = [1, 1]} : vector<8x96xf32> to vector<8x64xf32>
    %176 = vector.extract_strided_slice %173 {offsets = [0, 0], sizes = [8, 64], strides = [1, 1]} : vector<8x96xf32> to vector<8x64xf32>
    %177 = arith.addf %175, %176 : vector<8x64xf32>
    %178 = arith.negf %177 : vector<8x64xf32>
    %179 = math.exp %178 : vector<8x64xf32>
    %cst_29 = arith.constant 1.000000e+00 : f32
    %180 = vector.broadcast %cst_29 : f32 to vector<8x64xf32>
    %181 = arith.addf %180, %179 : vector<8x64xf32>
    %182 = arith.divf %180, %181 : vector<8x64xf32>
    %183 = vector.extract_strided_slice %182 {offsets = [0, 0], sizes = [8, 32], strides = [1, 1]} : vector<8x64xf32> to vector<8x32xf32>
    %184 = vector.extract_strided_slice %182 {offsets = [0, 32], sizes = [8, 32], strides = [1, 1]} : vector<8x64xf32> to vector<8x32xf32>
    %185 = vector.extract_strided_slice %174 {offsets = [0, 64], sizes = [8, 32], strides = [1, 1]} : vector<8x96xf32> to vector<8x32xf32>
    %186 = vector.extract_strided_slice %173 {offsets = [0, 64], sizes = [8, 32], strides = [1, 1]} : vector<8x96xf32> to vector<8x32xf32>
    %187 = arith.mulf %183, %186 : vector<8x32xf32>
    %188 = arith.addf %185, %187 : vector<8x32xf32>
    %189 = math.tanh %188 : vector<8x32xf32>
    %cst_30 = arith.constant 1.000000e+00 : f32
    %190 = vector.broadcast %cst_30 : f32 to vector<8x32xf32>
    %191 = arith.subf %190, %184 : vector<8x32xf32>
    %192 = arith.mulf %191, %189 : vector<8x32xf32>
    %193 = arith.mulf %184, %171 : vector<8x32xf32>
    %194 = arith.addf %192, %193 : vector<8x32xf32>
    %cst_31 = arith.constant 0.000000e+00 : f32
    %195 = vector.broadcast %cst_31 : f32 to vector<8x32xf32>
    %196 = arith.cmpf oge, %194, %195 : vector<8x32xf32>
    %cst_32 = arith.constant 0.00999999977 : f32
    %197 = vector.broadcast %cst_32 : f32 to vector<8x32xf32>
    %198 = arith.mulf %197, %194 : vector<8x32xf32>
    %199 = arith.select %196, %194, %198 : vector<8x32xi1>, vector<8x32xf32>
    %c0_33 = arith.constant 0 : index
    %c0_34 = arith.constant 0 : index
    %200 = vector.load %arg2[%c0_33, %c0_34] : memref<8x3xf32, #tpu.memory_space<vmem>>, vector<8x3xf32>
    %cst_35 = arith.constant dense<0.000000e+00> : vector<8xf32>
    %201 = vector.multi_reduction <add>, %200, %cst_35 [1] : vector<8x3xf32> to vector<8xf32>
    %202 = vector.shape_cast %201 : vector<8xf32> to vector<8x1xf32>
    %cst_36 = arith.constant 0.000000e+00 : f32
    %203 = vector.broadcast %cst_36 : f32 to vector<8x1xf32>
    %204 = arith.cmpf ogt, %202, %203 : vector<8x1xf32>
    %cst_37 = arith.constant 1.000000e+00 : f32
    %205 = vector.broadcast %cst_37 : f32 to vector<8x1xf32>
    %206 = arith.divf %205, %202 : vector<8x1xf32>
    %cst_38 = arith.constant 0.000000e+00 : f32
    %207 = vector.broadcast %cst_38 : f32 to vector<8x1xf32>
    %208 = arith.select %204, %206, %207 : vector<8x1xi1>, vector<8x1xf32>
    %cst_39 = arith.constant dense<0.000000e+00> : vector<3xf32>
    %209 = vector.multi_reduction <add>, %200, %cst_39 [0] : vector<8x3xf32> to vector<3xf32>
    %210 = vector.shape_cast %209 : vector<3xf32> to vector<1x3xf32>
    %cst_40 = arith.constant 0.000000e+00 : f32
    %211 = vector.broadcast %cst_40 : f32 to vector<1x3xf32>
    %212 = arith.cmpf ogt, %210, %211 : vector<1x3xf32>
    %cst_41 = arith.constant 1.000000e+00 : f32
    %213 = vector.broadcast %cst_41 : f32 to vector<1x3xf32>
    %214 = arith.divf %213, %210 : vector<1x3xf32>
    %cst_42 = arith.constant 0.000000e+00 : f32
    %215 = vector.broadcast %cst_42 : f32 to vector<1x3xf32>
    %216 = arith.select %212, %214, %215 : vector<1x3xi1>, vector<1x3xf32>
    %217 = vector.broadcast %208 : vector<8x1xf32> to vector<8x3xf32>
    %218 = arith.mulf %217, %200 : vector<8x3xf32>
    %219 = vector.broadcast %216 : vector<1x3xf32> to vector<8x3xf32>
    %220 = arith.mulf %219, %200 : vector<8x3xf32>
    %cst_43 = arith.constant dense<0.000000e+00> : vector<8x8xf32>
    %221 = tpu.matmul %218, %220, %cst_43 {dimension_numbers = #tpu.dot_dimension_numbers<[1], [1], [0], [0], [0, 0, 1, 0], [], []>} : vector<8x3xf32>, vector<8x3xf32>, vector<8x8xf32> -> vector<8x8xf32>
    %c0_44 = arith.constant 0 : index
    %c0_45 = arith.constant 0 : index
    %222 = vector.load %arg3[%c0_44, %c0_45] : memref<33x68xf32, #tpu.memory_space<vmem>>, vector<32x32xf32>
    %c0_46 = arith.constant 0 : index
    %c32 = arith.constant 32 : index
    %223 = vector.load %arg3[%c0_46, %c32] : memref<33x68xf32, #tpu.memory_space<vmem>>, vector<32x32xf32>
    %c0_47 = arith.constant 0 : index
    %c64 = arith.constant 64 : index
    %224 = vector.load %arg3[%c0_47, %c64] : memref<33x68xf32, #tpu.memory_space<vmem>>, vector<32x4xf32>
    %c32_48 = arith.constant 32 : index
    %c0_49 = arith.constant 0 : index
    %225 = vector.load %arg3[%c32_48, %c0_49] : memref<33x68xf32, #tpu.memory_space<vmem>>, vector<1x32xf32>
    %c32_50 = arith.constant 32 : index
    %c32_51 = arith.constant 32 : index
    %226 = vector.load %arg3[%c32_50, %c32_51] : memref<33x68xf32, #tpu.memory_space<vmem>>, vector<1x32xf32>
    %c32_52 = arith.constant 32 : index
    %c64_53 = arith.constant 64 : index
    %227 = vector.load %arg3[%c32_52, %c64_53] : memref<33x68xf32, #tpu.memory_space<vmem>>, vector<1x4xf32>
    %cst_54 = arith.constant dense<0.000000e+00> : vector<8x32xf32>
    %228 = tpu.matmul %199, %222, %cst_54 {dimension_numbers = #tpu.dot_dimension_numbers<[1], [0], [0], [1], [0, 0, 1, 1], [], []>} : vector<8x32xf32>, vector<32x32xf32>, vector<8x32xf32> -> vector<8x32xf32>
    %cst_55 = arith.constant dense<0.000000e+00> : vector<8x32xf32>
    %229 = tpu.matmul %221, %228, %cst_55 {dimension_numbers = #tpu.dot_dimension_numbers<[1], [0], [0], [1], [0, 0, 1, 1], [], []>} : vector<8x8xf32>, vector<8x32xf32>, vector<8x32xf32> -> vector<8x32xf32>
    %230 = vector.broadcast %225 : vector<1x32xf32> to vector<8x32xf32>
    %231 = arith.addf %229, %230 : vector<8x32xf32>
    %cst_56 = arith.constant 0.000000e+00 : f32
    %232 = vector.broadcast %cst_56 : f32 to vector<8x32xf32>
    %233 = arith.cmpf oge, %231, %232 : vector<8x32xf32>
    %cst_57 = arith.constant 2.000000e-01 : f32
    %234 = vector.broadcast %cst_57 : f32 to vector<8x32xf32>
    %235 = arith.mulf %234, %231 : vector<8x32xf32>
    %236 = arith.select %233, %231, %235 : vector<8x32xi1>, vector<8x32xf32>
    %cst_58 = arith.constant dense<0.000000e+00> : vector<8x32xf32>
    %237 = tpu.matmul %236, %223, %cst_58 {dimension_numbers = #tpu.dot_dimension_numbers<[1], [0], [0], [1], [0, 0, 1, 1], [], []>} : vector<8x32xf32>, vector<32x32xf32>, vector<8x32xf32> -> vector<8x32xf32>
    %cst_59 = arith.constant dense<0.000000e+00> : vector<8x32xf32>
    %238 = tpu.matmul %221, %237, %cst_59 {dimension_numbers = #tpu.dot_dimension_numbers<[1], [0], [0], [1], [0, 0, 1, 1], [], []>} : vector<8x8xf32>, vector<8x32xf32>, vector<8x32xf32> -> vector<8x32xf32>
    %239 = vector.broadcast %226 : vector<1x32xf32> to vector<8x32xf32>
    %240 = arith.addf %238, %239 : vector<8x32xf32>
    %cst_60 = arith.constant 0.000000e+00 : f32
    %241 = vector.broadcast %cst_60 : f32 to vector<8x32xf32>
    %242 = arith.cmpf oge, %240, %241 : vector<8x32xf32>
    %cst_61 = arith.constant 2.000000e-01 : f32
    %243 = vector.broadcast %cst_61 : f32 to vector<8x32xf32>
    %244 = arith.mulf %243, %240 : vector<8x32xf32>
    %245 = arith.select %242, %240, %244 : vector<8x32xi1>, vector<8x32xf32>
    %cst_62 = arith.constant dense<0.000000e+00> : vector<8x4xf32>
    %246 = tpu.matmul %245, %224, %cst_62 {dimension_numbers = #tpu.dot_dimension_numbers<[1], [0], [0], [1], [0, 0, 1, 1], [], []>} : vector<8x32xf32>, vector<32x4xf32>, vector<8x4xf32> -> vector<8x4xf32>
    %247 = vector.broadcast %227 : vector<1x4xf32> to vector<8x4xf32>
    %248 = arith.addf %246, %247 : vector<8x4xf32>
    %cst_63 = arith.constant 0.000000e+00 : f32
    %249 = vector.broadcast %cst_63 : f32 to vector<8x4xf32>
    %250 = arith.cmpf oge, %248, %249 : vector<8x4xf32>
    %cst_64 = arith.constant 0.00999999977 : f32
    %251 = vector.broadcast %cst_64 : f32 to vector<8x4xf32>
    %252 = arith.mulf %251, %248 : vector<8x4xf32>
    %253 = arith.select %250, %248, %252 : vector<8x4xi1>, vector<8x4xf32>
    %c0_65 = arith.constant 0 : index
    %c0_66 = arith.constant 0 : index
    %254 = vector.load %arg4[%c0_65, %c0_66] : memref<8x4xf32, #tpu.memory_space<vmem>>, vector<8x4xf32>
    tpu.vector_store %arg4[%c0_65, %c0_66], %253 {strides = array<i32>} : memref<8x4xf32, #tpu.memory_space<vmem>>, vector<8x4xf32>,
    return
  }
}

</mosaic_0001>

<bundles_post_ra>
// kernel: tpu_custom_call.1
= control target key start
LH: loop header
LB: loop body
LE: loop exit
PB: predicated region body
PF: predicated region fallthrough
CT: control target
= control target key end

     0   :  { %9 = vsyncpa [#allocation3], 0  ;;  %s1012_s18 = smov [#allocation2]   ;;  %s1013_s20 = smov 128   ;;  %s1233_s0 = inlined_call_operand.vmem [shape: f32[64,8], index: 0, kind: input, shape index: {}]   ;;  %s1234_s1 = inlined_call_operand.vmem [shape: f32[42,96], index: 1, kind: input, shape index: {}]   ;;  %s1235_s2 = inlined_call_operand.vmem [shape: f32[8,3], index: 2, kind: input, shape index: {}]   ;;  %s1236_s3 = inlined_call_operand.hbm [shape: f32[33,68], index: 3, kind: input, shape index: {}]   ;;  %s1237_s4 = inlined_call_operand.vmem [shape: f32[8,4], index: 4, kind: output, shape index: {}]  }
   0x1   :  { %s20_s17 = sshll.u32 %s1236_s3, 4  ;;  %s22_s19 = sshll.u32 %s1012_s18, 4  ;;  %s21_s17 = int_to_ptr.hbm [resolvable:$true] %s20_s17  ;;  %s23_s19 = int_to_ptr.vmem [resolvable:$true] %s22_s19 }
   0x2   :  { %s1014_s21 = smov 8  }
   0x3   :  { %28 = dma.hbm_to_vmem [thread:$0]  %s21_s17, 640, %s23_s19, [#allocation3], %s1013_s20, %s1013_s20, %s1014_s21  }
   0x4   :  { %1010 = dma.done.wait [#allocation3], 640  }
   0x5   :  { %1011 = vsyncadd [#allocation3], 4294966656  ;;  %v1049_v0 = vld [vmem:[%s1234_s1 + $0x20] sm:$0xff]  ;;  %v1054_v1 = vld [vmem:[%s1234_s1 + $0x18] sm:$0xff]  ;;  %vm49_vm0 = vcmask 64512   ;;  %v1015_v6 = vmov 0.0  }
   0x6   :  { %132 = vmatpush.msra.mxu1 %v1049_v0  ;;  %v33_v2 = vld [vmem:[%s1234_s1] sm:$0xff]  ;;  %196 = vmatpush.msra.mxu2 %v1049_v0  ;;  %v1067_v4 = vld [vmem:[%s1234_s1 + $0x10] sm:$0xff]  ;;  %v1074_v5 = vld [vmem:[%s1234_s1 + $0x8] sm:$0xff]  ;;  %s1016_s9 = smov 64   ;;  %vm116_vm5 = vcmask 261120  }
   0x7   :  { %v40_v3 = vld [vmem:[%s1233_s0] sm:$0xff]  ;;  %89 = vmatpush.msra.mxu0 %v33_v2  ;;  %904 = vmatpush.msra.mxu3 %v33_v2  ;;  %v1100_v7 = vld [vmem:[%s1234_s1 + $0x29] ss:$0 sm:$0xff]  ;;  %v1107_v10 = vld [vmem:[%s1234_s1 + $0x28] ss:$0 sm:$0xff]  ;;  %s1017_s1 = smov 96  }
   0x8   :  { %133 = vmatpush.msra.mxu1 %v1054_v1  ;;  %874 = vmatmul.msk.f32.vlgmr.msra.gmra.mxu0 %vm49_vm0, %v40_v3  ;;  %v41_v37 = vld [vmem:[%s1233_s0 + $0x8] sm:$0xff]  ;;  %v46_v62 = vld [vmem:[%s1233_s0 + $0x30] sm:$0xff]  ;;  %v47_v63 = vld [vmem:[%s1233_s0 + $0x38] sm:$0xff] }
   0x9   :  { %197 = vmatpush.msra.mxu2 %v1054_v1  ;;  %260 = vmatpush.msrb.mxu3 %v1049_v0 }
   0xa   :  { %134 = vmatpush.msra.mxu1 %v1067_v4  ;;  %880 = vmatmul.msk.f32.vlgmr.msra.gmra.mxu3 %vm49_vm0, %v46_v62 }
   0xb   :  { %198 = vmatpush.msra.mxu2 %v1067_v4  ;;  %261 = vmatpush.msrb.mxu3 %v1054_v1 }
   0xc   :  { %135 = vmatpush.msra.mxu1 %v1074_v5 }
   0xd   :  { %136 = vmatmul.f32.vlgmr.msra.gmra.mxu1 %v1015_v6  ;;  %199 = vmatpush.msra.mxu2 %v1074_v5 }
   0xe   :  { %262 = vmatpush.msrb.mxu3 %v1067_v4  ;;  %324 = vmatpush.msrb.mxu1 %v1049_v0 }
   0xf   :  { %388 = vmatpush.msrb.mxu2 %v1049_v0 }
  0x10   :  { %263 = vmatpush.msrb.mxu3 %v1074_v5  ;;  %325 = vmatpush.msrb.mxu1 %v1054_v1 }
  0x11   :  { %389 = vmatpush.msrb.mxu2 %v1054_v1  ;;  %875 = vmatmul.msk.f32.gmra.mxu0 %vm49_vm0, %v41_v37 }
  0x12   :  { %326 = vmatpush.msrb.mxu1 %v1067_v4  ;;  %452 = vmatpush.msra.mxu3 %v1049_v0 }
  0x13   :  { %390 = vmatpush.msrb.mxu2 %v1067_v4  ;;  %881 = vmatmul.msk.f32.gmra.mxu3 %vm49_vm0, %v47_v63 }
  0x14   :  { %327 = vmatpush.msrb.mxu1 %v1074_v5  ;;  %453 = vmatpush.msra.mxu3 %v1054_v1 }
  0x15   :  { %391 = vmatpush.msrb.mxu2 %v1074_v5 }
  0x16   :  { %516 = vmatpush.msra.mxu1 %v1049_v0  ;;  %454 = vmatpush.msra.mxu3 %v1067_v4 }
  0x18   :  { %517 = vmatpush.msra.mxu1 %v1054_v1  ;;  %455 = vmatpush.msra.mxu3 %v1074_v5 }
  0x1a   :  { %518 = vmatpush.msra.mxu1 %v1067_v4 }
  0x1c   :  { %519 = vmatpush.msra.mxu1 %v1074_v5 }
  0x85   :  { %v91_v11 = vpop.f32.mrf.mxu0 }
  0x86   :  { %v92_v12 = vadd.f32 %v1107_v10, %v91_v11 }
  0x8a   :  { %v137_v8 = vpop.f32.mrf.mxu1 }
  0x8b   :  { %v138_v9 = vadd.f32 %v1100_v7, %v137_v8 }
  0x8d   :  { %161 = vrot.lane.b32.xlu0 %v138_v9, %s1016_s9  ;;  %v140_v13 = vadd.f32 %v138_v9, %v92_v12 }
  0x8e   :  { %v94_v41 = vpop.f32.mrf.mxu0 }
  0x8f   :  { %v882_v14 = vmul.f32 -1.442695, %v140_v13  ;;  %v95_v42 = vadd.f32 %v1107_v10, %v94_v41 }
  0x91   :  { %934 = vpow2.f32 %v882_v14 }
  0x97   :  { %v935_v15 = vpop.eup %934 }
  0x98   :  { %v144_v16 = vadd.f32 1.0, %v935_v15 }
  0x9a   :  { %936 = vrcp.f32 %v144_v16  ;;  %v156_v22 = vand.u32 2147483648, %v144_v16  ;;  %vm150_vm2 = vweird.f32 %v144_v16  ;;  %v154_v23 = vand.u32 2147483647, %v144_v16 }
  0x9c   :  { %v157_v25 = vor.u32 1.1754944e-38, %v156_v22  ;;  %vm155_vm4 = vcmp.eq.f32.partialorder %v154_v23, 8.507059e+37 }
  0xa0   :  { %v937_v17 = vpop.eup %936 }
  0xa1   :  { %v146_v18 = vmul.f32 %v937_v17, %v144_v16  ;;  %vm151_vm1 = vweird.f32 %v937_v17 }
  0xa2   :  { %vm152_vm3 = vmor %vm150_vm2, %vm151_vm1 }
  0xa3   :  { %v147_v19 = vsub.f32 1.0, %v146_v18 }
  0xa5   :  { %v148_v20 = vmul.f32 %v937_v17, %v147_v19 }
  0xa7   :  { %v149_v21 = vadd.f32 %v937_v17, %v148_v20 }
  0xa9   :  { %v153_v24 = vsel %vm152_vm3, %v937_v17, %v149_v21 }
  0xaa   :  { %v158_v27 = vsel %vm155_vm4, %v157_v25, %v153_v24 }
  0xab   :  { %v171_v32 = vsub.f32 1.0, %v158_v27  ;;  %v177_v34 = vmul.f32 0.0, %v158_v27 }
  0xff   :  { %v162_v26 = vpop.permute.xlu0 %161 }
 0x100   :  { %v164_v28 = vmul.f32 %v162_v26, %v158_v27 }
 0x102   :  { %166 = vrot.lane.b32.xlu0 %v164_v28, %s1016_s9 }
 0x174   :  { %v167_v29 = vpop.permute.xlu0 %166 }
 0x175   :  { %v169_v30 = vadd.f32 %v167_v29, %v92_v12 }
 0x177   :  { %938 = vtanh.f32 %v169_v30 }
 0x17d   :  { %v939_v31 = vpop.eup %938 }
 0x17e   :  { %173 = vrot.lane.b32.xlu1 %v939_v31, %s1017_s1 }
 0x1f0   :  { %v174_v33 = vpop.permute.xlu1 %173 }
 0x1f1   :  { %v176_v35 = vmul.f32 %v174_v33, %v171_v32 }
 0x1f3   :  { %v178_v36 = vadd.f32 %v177_v34, %v176_v35 }
 0x1f5   :  { %180 = vrot.lane.b32.xlu1 %v178_v36, %s1017_s1 }
 0x267   :  { %v181_v38 = vpop.permute.xlu1 %180 }
 0x268   :  { %883 = vmatmul.msk.f32.vlgmr.msra.gmra.mxu2 %vm116_vm5, %v181_v38 }
 0x269   :  { %580 = vmatpush.msra.mxu2 %v1049_v0  ;;  %v42_v0 = vld [vmem:[%s1233_s0 + $0x10] sm:$0xff] }
 0x26a   :  { %876 = vmatmul.msk.f32.gmra.mxu0 %vm49_vm0, %v42_v0  ;;  %v44_v0 = vld [vmem:[%s1233_s0 + $0x20] sm:$0xff] }
 0x26b   :  { %581 = vmatpush.msra.mxu2 %v1054_v1 }
 0x26d   :  { %582 = vmatpush.msra.mxu2 %v1067_v4  ;;  %v1145_v4 = vpop.f32.mrf.mxu3 }
 0x26f   :  { %583 = vmatpush.msra.mxu2 %v1074_v5 }
 0x275   :  { %v1147_v5 = vpop.f32.mrf.mxu3 }
 0x2e7   :  { %v97_v13 = vpop.f32.mrf.mxu0 }
 0x2e8   :  { %v98_v14 = vadd.f32 %v1107_v10, %v97_v13 }
 0x2eb   :  { %v201_v39 = vpop.f32.mrf.mxu2 }
 0x2ec   :  { %v202_v40 = vadd.f32 %v1100_v7, %v201_v39  ;;  %v43_v39 = vld [vmem:[%s1233_s0 + $0x18] sm:$0xff] }
 0x2ed   :  { %877 = vmatmul.msk.f32.gmra.mxu0 %vm49_vm0, %v43_v39  ;;  %v45_v39 = vld [vmem:[%s1233_s0 + $0x28] sm:$0xff] }
 0x2ee   :  { %225 = vrot.lane.b32.xlu2 %v202_v40, %s1016_s9  ;;  %v204_v43 = vadd.f32 %v202_v40, %v95_v42 }
 0x2f0   :  { %v884_v44 = vmul.f32 -1.442695, %v204_v43 }
 0x2f2   :  { %940 = vpow2.f32 %v884_v44 }
 0x2f5   :  { %878 = vmatmul.msk.f32.gmra.mxu0 %vm49_vm0, %v44_v0 }
 0x2f8   :  { %v941_v45 = vpop.eup %940 }
 0x2f9   :  { %v208_v46 = vadd.f32 1.0, %v941_v45 }
 0x2fb   :  { %942 = vrcp.f32 %v208_v46  ;;  %v220_v52 = vand.u32 2147483648, %v208_v46  ;;  %vm214_vm7 = vweird.f32 %v208_v46  ;;  %v218_v53 = vand.u32 2147483647, %v208_v46 }
 0x2fd   :  { %v221_v55 = vor.u32 1.1754944e-38, %v220_v52  ;;  %vm219_vm9 = vcmp.eq.f32.partialorder %v218_v53, 8.507059e+37  ;;  %879 = vmatmul.msk.f32.gmra.mxu0 %vm49_vm0, %v45_v39  ;;  %v113_v39 = vadd.f32 %v1107_v10, %v1147_v5 }
 0x301   :  { %v943_v47 = vpop.eup %942 }
 0x302   :  { %v210_v48 = vmul.f32 %v943_v47, %v208_v46  ;;  %vm215_vm6 = vweird.f32 %v943_v47 }
 0x303   :  { %vm216_vm8 = vmor %vm214_vm7, %vm215_vm6 }
 0x304   :  { %v211_v49 = vsub.f32 1.0, %v210_v48 }
 0x306   :  { %v212_v50 = vmul.f32 %v943_v47, %v211_v49 }
 0x308   :  { %v213_v51 = vadd.f32 %v943_v47, %v212_v50 }
 0x30a   :  { %v217_v54 = vsel %vm216_vm8, %v943_v47, %v213_v51 }
 0x30b   :  { %v222_v57 = vsel %vm219_vm9, %v221_v55, %v217_v54 }
 0x30c   :  { %v235_v2 = vsub.f32 1.0, %v222_v57  ;;  %v241_v6 = vmul.f32 %v222_v57, %v178_v36 }
 0x348   :  { %v226_v56 = vpop.permute.xlu2 %225 }
 0x349   :  { %v228_v58 = vmul.f32 %v226_v56, %v222_v57 }
 0x34b   :  { %230 = vrot.lane.b32.xlu2 %v228_v58, %s1016_s9 }
 0x36a   :  { %v100_v43 = vpop.f32.mrf.mxu0 }
 0x36b   :  { %v101_v44 = vadd.f32 %v1107_v10, %v100_v43 }
 0x372   :  { %v103_v13 = vpop.f32.mrf.mxu0 }
 0x37a   :  { %v106_v43 = vpop.f32.mrf.mxu0 }
 0x3a5   :  { %v231_v59 = vpop.permute.xlu2 %230 }
 0x3a6   :  { %v233_v60 = vadd.f32 %v231_v59, %v95_v42 }
 0x3a8   :  { %944 = vtanh.f32 %v233_v60 }
 0x3ae   :  { %v945_v61 = vpop.eup %944 }
 0x3af   :  { %237 = vrot.lane.b32.xlu0 %v945_v61, %s1017_s1 }
 0x421   :  { %v238_v3 = vpop.permute.xlu0 %237 }
 0x422   :  { %v240_v8 = vmul.f32 %v238_v3, %v235_v2 }
 0x424   :  { %v242_v9 = vadd.f32 %v241_v6, %v240_v8 }
 0x426   :  { %244 = vrot.lane.b32.xlu1 %v242_v9, %s1017_s1 }
 0x498   :  { %v245_v1 = vpop.permute.xlu1 %244 }
 0x499   :  { %885 = vmatmul.msk.f32.vlgmr.msrb.gmra.mxu3 %vm116_vm5, %v245_v1 }
 0x51c   :  { %v265_v11 = vpop.f32.mrf.mxu3 }
 0x51d   :  { %v266_v12 = vadd.f32 %v1100_v7, %v265_v11 }
 0x51f   :  { %289 = vrot.lane.b32.xlu2 %v266_v12, %s1016_s9  ;;  %v268_v15 = vadd.f32 %v266_v12, %v98_v14 }
 0x521   :  { %v886_v16 = vmul.f32 -1.442695, %v268_v15 }
 0x523   :  { %946 = vpow2.f32 %v886_v16 }
 0x529   :  { %v947_v17 = vpop.eup %946 }
 0x52a   :  { %v272_v18 = vadd.f32 1.0, %v947_v17 }
 0x52c   :  { %948 = vrcp.f32 %v272_v18  ;;  %v284_v24 = vand.u32 2147483648, %v272_v18  ;;  %vm278_vm11 = vweird.f32 %v272_v18  ;;  %v282_v25 = vand.u32 2147483647, %v272_v18 }
 0x52e   :  { %v285_v27 = vor.u32 1.1754944e-38, %v284_v24  ;;  %vm283_vm13 = vcmp.eq.f32.partialorder %v282_v25, 8.507059e+37 }
 0x532   :  { %v949_v19 = vpop.eup %948 }
 0x533   :  { %v274_v20 = vmul.f32 %v949_v19, %v272_v18  ;;  %vm279_vm10 = vweird.f32 %v949_v19 }
 0x534   :  { %vm280_vm12 = vmor %vm278_vm11, %vm279_vm10 }
 0x535   :  { %v275_v21 = vsub.f32 1.0, %v274_v20 }
 0x537   :  { %v276_v22 = vmul.f32 %v949_v19, %v275_v21 }
 0x539   :  { %v277_v23 = vadd.f32 %v949_v19, %v276_v22 }
 0x53b   :  { %v281_v26 = vsel %vm280_vm12, %v949_v19, %v277_v23 }
 0x53c   :  { %v286_v29 = vsel %vm283_vm13, %v285_v27, %v281_v26 }
 0x53d   :  { %v299_v34 = vsub.f32 1.0, %v286_v29  ;;  %v305_v36 = vmul.f32 %v286_v29, %v242_v9 }
 0x579   :  { %v290_v28 = vpop.permute.xlu2 %289 }
 0x57a   :  { %v292_v30 = vmul.f32 %v290_v28, %v286_v29 }
 0x57c   :  { %294 = vrot.lane.b32.xlu0 %v292_v30, %s1016_s9 }
 0x5ee   :  { %v295_v31 = vpop.permute.xlu0 %294 }
 0x5ef   :  { %v297_v32 = vadd.f32 %v295_v31, %v98_v14  ;;  %v104_v14 = vadd.f32 %v1107_v10, %v103_v13 }
 0x5f1   :  { %950 = vtanh.f32 %v297_v32 }
 0x5f7   :  { %v951_v33 = vpop.eup %950 }
 0x5f8   :  { %301 = vrot.lane.b32.xlu1 %v951_v33, %s1017_s1 }
 0x66a   :  { %v302_v35 = vpop.permute.xlu1 %301 }
 0x66b   :  { %v304_v37 = vmul.f32 %v302_v35, %v299_v34 }
 0x66d   :  { %v306_v38 = vadd.f32 %v305_v36, %v304_v37 }
 0x66f   :  { %308 = vrot.lane.b32.xlu2 %v306_v38, %s1017_s1 }
 0x6c9   :  { %v309_v40 = vpop.permute.xlu2 %308 }
 0x6ca   :  { %887 = vmatmul.msk.f32.vlgmr.msrb.gmra.mxu1 %vm116_vm5, %v309_v40 }
 0x747   :  { %v329_v41 = vpop.f32.mrf.mxu1 }
 0x748   :  { %v330_v42 = vadd.f32 %v1100_v7, %v329_v41 }
 0x74a   :  { %353 = vrot.lane.b32.xlu0 %v330_v42, %s1016_s9  ;;  %v332_v45 = vadd.f32 %v330_v42, %v101_v44 }
 0x74c   :  { %v888_v46 = vmul.f32 -1.442695, %v332_v45 }
 0x74e   :  { %952 = vpow2.f32 %v888_v46 }
 0x754   :  { %v953_v47 = vpop.eup %952 }
 0x755   :  { %v336_v48 = vadd.f32 1.0, %v953_v47 }
 0x757   :  { %954 = vrcp.f32 %v336_v48  ;;  %v348_v54 = vand.u32 2147483648, %v336_v48  ;;  %vm342_vm15 = vweird.f32 %v336_v48  ;;  %v346_v55 = vand.u32 2147483647, %v336_v48 }
 0x759   :  { %v349_v57 = vor.u32 1.1754944e-38, %v348_v54  ;;  %vm347_vm2 = vcmp.eq.f32.partialorder %v346_v55, 8.507059e+37 }
 0x75d   :  { %v955_v49 = vpop.eup %954 }
 0x75e   :  { %v338_v50 = vmul.f32 %v955_v49, %v336_v48  ;;  %vm343_vm14 = vweird.f32 %v955_v49 }
 0x75f   :  { %vm344_vm1 = vmor %vm342_vm15, %vm343_vm14 }
 0x760   :  { %v339_v51 = vsub.f32 1.0, %v338_v50 }
 0x762   :  { %v340_v52 = vmul.f32 %v955_v49, %v339_v51 }
 0x764   :  { %v341_v53 = vadd.f32 %v955_v49, %v340_v52 }
 0x766   :  { %v345_v56 = vsel %vm344_vm1, %v955_v49, %v341_v53 }
 0x767   :  { %v350_v59 = vsel %vm347_vm2, %v349_v57, %v345_v56 }
 0x768   :  { %v363_v2 = vsub.f32 1.0, %v350_v59  ;;  %v369_v6 = vmul.f32 %v350_v59, %v306_v38 }
 0x7bc   :  { %v354_v58 = vpop.permute.xlu0 %353 }
 0x7bd   :  { %v356_v60 = vmul.f32 %v354_v58, %v350_v59 }
 0x7bf   :  { %358 = vrot.lane.b32.xlu1 %v356_v60, %s1016_s9 }
 0x831   :  { %v359_v61 = vpop.permute.xlu1 %358 }
 0x832   :  { %v361_v62 = vadd.f32 %v359_v61, %v101_v44  ;;  %v107_v44 = vadd.f32 %v1107_v10, %v106_v43 }
 0x834   :  { %956 = vtanh.f32 %v361_v62 }
 0x83a   :  { %v957_v63 = vpop.eup %956 }
 0x83b   :  { %365 = vrot.lane.b32.xlu2 %v957_v63, %s1017_s1 }
 0x895   :  { %v366_v3 = vpop.permute.xlu2 %365 }
 0x896   :  { %v368_v8 = vmul.f32 %v366_v3, %v363_v2 }
 0x898   :  { %v370_v9 = vadd.f32 %v369_v6, %v368_v8 }
 0x89a   :  { %372 = vrot.lane.b32.xlu0 %v370_v9, %s1017_s1 }
 0x90c   :  { %v373_v1 = vpop.permute.xlu0 %372 }
 0x90d   :  { %889 = vmatmul.msk.f32.vlgmr.msrb.gmra.mxu2 %vm116_vm5, %v373_v1 }
 0x990   :  { %v393_v11 = vpop.f32.mrf.mxu2 }
 0x991   :  { %v394_v12 = vadd.f32 %v1100_v7, %v393_v11 }
 0x993   :  { %417 = vrot.lane.b32.xlu1 %v394_v12, %s1016_s9  ;;  %v396_v15 = vadd.f32 %v394_v12, %v104_v14  ;;  %v110_v12 = vadd.f32 %v1107_v10, %v1145_v4 }
 0x995   :  { %v890_v16 = vmul.f32 -1.442695, %v396_v15 }
 0x997   :  { %958 = vpow2.f32 %v890_v16 }
 0x99d   :  { %v959_v17 = vpop.eup %958 }
 0x99e   :  { %v400_v18 = vadd.f32 1.0, %v959_v17 }
 0x9a0   :  { %960 = vrcp.f32 %v400_v18  ;;  %v412_v24 = vand.u32 2147483648, %v400_v18  ;;  %vm406_vm4 = vweird.f32 %v400_v18  ;;  %v410_v25 = vand.u32 2147483647, %v400_v18 }
 0x9a2   :  { %v413_v27 = vor.u32 1.1754944e-38, %v412_v24  ;;  %vm411_vm7 = vcmp.eq.f32.partialorder %v410_v25, 8.507059e+37 }
 0x9a6   :  { %v961_v19 = vpop.eup %960 }
 0x9a7   :  { %v402_v20 = vmul.f32 %v961_v19, %v400_v18  ;;  %vm407_vm3 = vweird.f32 %v961_v19 }
 0x9a8   :  { %vm408_vm6 = vmor %vm406_vm4, %vm407_vm3 }
 0x9a9   :  { %v403_v21 = vsub.f32 1.0, %v402_v20 }
 0x9ab   :  { %v404_v22 = vmul.f32 %v961_v19, %v403_v21 }
 0x9ad   :  { %v405_v23 = vadd.f32 %v961_v19, %v404_v22 }
 0x9af   :  { %v409_v26 = vsel %vm408_vm6, %v961_v19, %v405_v23  ;;  %vm631_vm6 = vcmask 23552  }
 0x9b0   :  { %v414_v29 = vsel %vm411_vm7, %v413_v27, %v409_v26 }
 0x9b1   :  { %v427_v34 = vsub.f32 1.0, %v414_v29  ;;  %v433_v36 = vmul.f32 %v414_v29, %v370_v9 }
 0xa05   :  { %v418_v28 = vpop.permute.xlu1 %417 }
 0xa06   :  { %v420_v30 = vmul.f32 %v418_v28, %v414_v29 }
 0xa08   :  { %422 = vrot.lane.b32.xlu2 %v420_v30, %s1016_s9 }
 0xa62   :  { %v423_v31 = vpop.permute.xlu2 %422 }
 0xa63   :  { %v425_v32 = vadd.f32 %v423_v31, %v104_v14 }
 0xa65   :  { %962 = vtanh.f32 %v425_v32 }
 0xa6b   :  { %v963_v33 = vpop.eup %962 }
 0xa6c   :  { %429 = vrot.lane.b32.xlu0 %v963_v33, %s1017_s1 }
 0xade   :  { %v430_v35 = vpop.permute.xlu0 %429 }
 0xadf   :  { %v432_v37 = vmul.f32 %v430_v35, %v427_v34 }
 0xae1   :  { %v434_v38 = vadd.f32 %v433_v36, %v432_v37 }
 0xae3   :  { %436 = vrot.lane.b32.xlu1 %v434_v38, %s1017_s1 }
 0xb55   :  { %v437_v40 = vpop.permute.xlu1 %436 }
 0xb56   :  { %891 = vmatmul.msk.f32.vlgmr.msra.gmra.mxu3 %vm116_vm5, %v437_v40 }
 0xbd9   :  { %v457_v41 = vpop.f32.mrf.mxu3 }
 0xbda   :  { %v458_v42 = vadd.f32 %v1100_v7, %v457_v41 }
 0xbdc   :  { %481 = vrot.lane.b32.xlu2 %v458_v42, %s1016_s9  ;;  %v460_v45 = vadd.f32 %v458_v42, %v107_v44 }
 0xbde   :  { %v892_v46 = vmul.f32 -1.442695, %v460_v45 }
 0xbe0   :  { %964 = vpow2.f32 %v892_v46 }
 0xbe6   :  { %v965_v47 = vpop.eup %964 }
 0xbe7   :  { %v464_v48 = vadd.f32 1.0, %v965_v47 }
 0xbe9   :  { %966 = vrcp.f32 %v464_v48  ;;  %v476_v54 = vand.u32 2147483648, %v464_v48  ;;  %vm470_vm9 = vweird.f32 %v464_v48  ;;  %v474_v55 = vand.u32 2147483647, %v464_v48 }
 0xbeb   :  { %v477_v57 = vor.u32 1.1754944e-38, %v476_v54  ;;  %vm475_vm11 = vcmp.eq.f32.partialorder %v474_v55, 8.507059e+37 }
 0xbef   :  { %v967_v49 = vpop.eup %966 }
 0xbf0   :  { %v466_v50 = vmul.f32 %v967_v49, %v464_v48  ;;  %vm471_vm8 = vweird.f32 %v967_v49 }
 0xbf1   :  { %vm472_vm10 = vmor %vm470_vm9, %vm471_vm8 }
 0xbf2   :  { %v467_v51 = vsub.f32 1.0, %v466_v50 }
 0xbf4   :  { %v468_v52 = vmul.f32 %v967_v49, %v467_v51 }
 0xbf6   :  { %v469_v53 = vadd.f32 %v967_v49, %v468_v52 }
 0xbf8   :  { %v473_v56 = vsel %vm472_vm10, %v967_v49, %v469_v53  ;;  %v630_v53 = vld [vmem:[%s1235_s2] sm:$0xff] }
 0xbf9   :  { %v478_v59 = vsel %vm475_vm11, %v477_v57, %v473_v56  ;;  %v632_v54 = vsel %vm631_vm6, %v630_v53, 0.0 }
 0xbfa   :  { %v491_v2 = vsub.f32 1.0, %v478_v59  ;;  %v497_v6 = vmul.f32 %v478_v59, %v434_v38  ;;  %v652_v55 = vrot.slane %v632_v54, 4 }
 0xbfc   :  { %v653_v56 = vadd.f32 %v652_v55, %v632_v54 }
 0xbfe   :  { %v654_v57 = vrot.slane %v653_v56, 2 }
 0xc36   :  { %v482_v58 = vpop.permute.xlu2 %481 }
 0xc37   :  { %v484_v60 = vmul.f32 %v482_v58, %v478_v59  ;;  %v655_v58 = vadd.f32 %v654_v57, %v653_v56 }
 0xc39   :  { %486 = vrot.lane.b32.xlu0 %v484_v60, %s1016_s9  ;;  %v656_v59 = vrot.slane %v655_v58, 1 }
 0xc3b   :  { %v657_v60 = vadd.f32 %v656_v59, %v655_v58 }
 0xc3d   :  { %vm664_vm7 = vweird.f32 %v657_v60  ;;  %vm658_vm11 = vcmp.gt.f32.partialorder %v657_v60, 0.0 }
 0xcab   :  { %v487_v61 = vpop.permute.xlu0 %486 }
 0xcac   :  { %v489_v62 = vadd.f32 %v487_v61, %v107_v44 }
 0xcae   :  { %968 = vtanh.f32 %v489_v62 }
 0xcb4   :  { %v969_v63 = vpop.eup %968 }
 0xcb5   :  { %493 = vrot.lane.b32.xlu1 %v969_v63, %s1017_s1 }
 0xd27   :  { %v494_v3 = vpop.permute.xlu1 %493 }
 0xd28   :  { %v496_v8 = vmul.f32 %v494_v3, %v491_v2  ;;  %v670_v2 = vand.u32 2147483648, %v657_v60 }
 0xd2a   :  { %v498_v9 = vadd.f32 %v497_v6, %v496_v8  ;;  %v668_v8 = vand.u32 2147483647, %v657_v60 }
 0xd2c   :  { %500 = vrot.lane.b32.xlu2 %v498_v9, %s1017_s1  ;;  %vm669_vm10 = vcmp.eq.f32.partialorder %v668_v8, 8.507059e+37 }
 0xd86   :  { %v501_v0 = vpop.permute.xlu2 %500 }
 0xd87   :  { %893 = vmatmul.msk.f32.vlgmr.msra.gmra.mxu1 %vm116_vm5, %v501_v0  ;;  %v671_v0 = vor.u32 1.1754944e-38, %v670_v2 }
 0xe04   :  { %v521_v1 = vpop.f32.mrf.mxu1 }
 0xe05   :  { %v522_v11 = vadd.f32 %v1100_v7, %v521_v1 }
 0xe07   :  { %545 = vrot.lane.b32.xlu0 %v522_v11, %s1016_s9  ;;  %v524_v13 = vadd.f32 %v522_v11, %v110_v12 }
 0xe09   :  { %v894_v14 = vmul.f32 -1.442695, %v524_v13 }
 0xe0b   :  { %970 = vpow2.f32 %v894_v14 }
 0xe11   :  { %v971_v15 = vpop.eup %970 }
 0xe12   :  { %v528_v16 = vadd.f32 1.0, %v971_v15 }
 0xe14   :  { %972 = vrcp.f32 %v528_v16  ;;  %v540_v22 = vand.u32 2147483648, %v528_v16  ;;  %vm534_vm13 = vweird.f32 %v528_v16  ;;  %v538_v23 = vand.u32 2147483647, %v528_v16 }
 0xe16   :  { %v541_v25 = vor.u32 1.1754944e-38, %v540_v22  ;;  %vm539_vm15 = vcmp.eq.f32.partialorder %v538_v23, 8.507059e+37 }
 0xe1a   :  { %v973_v17 = vpop.eup %972 }
 0xe1b   :  { %v530_v18 = vmul.f32 %v973_v17, %v528_v16  ;;  %vm535_vm12 = vweird.f32 %v973_v17 }
 0xe1c   :  { %vm536_vm14 = vmor %vm534_vm13, %vm535_vm12 }
 0xe1d   :  { %v531_v19 = vsub.f32 1.0, %v530_v18  ;;  %v705_v18 = vld [vmem:[#allocation2 + $0x10] sm:$0xff] }
 0xe1f   :  { %v532_v20 = vmul.f32 %v973_v17, %v531_v19  ;;  %v704_v19 = vld [vmem:[#allocation2 + $0x8] sm:$0xff] }
 0xe21   :  { %v533_v21 = vadd.f32 %v973_v17, %v532_v20  ;;  %v703_v20 = vld [vmem:[#allocation2] sm:$0xff] }
 0xe23   :  { %v537_v24 = vsel %vm536_vm14, %v973_v17, %v533_v21  ;;  %v706_v17 = vld [vmem:[#allocation2 + $0x18] sm:$0xff] }
 0xe24   :  { %v542_v26 = vsel %vm539_vm15, %v541_v25, %v537_v24  ;;  %725 = vmatpush.msrb.mxu1 %v706_v17 }
 0xe25   :  { %v555_v31 = vsub.f32 1.0, %v542_v26  ;;  %v561_v33 = vmul.f32 %v542_v26, %v498_v9 }
 0xe26   :  { %726 = vmatpush.msrb.mxu1 %v705_v18 }
 0xe28   :  { %727 = vmatpush.msrb.mxu1 %v704_v19 }
 0xe2a   :  { %728 = vmatpush.msrb.mxu1 %v703_v20 }
 0xe79   :  { %v546_v4 = vpop.permute.xlu0 %545 }
 0xe7a   :  { %v548_v27 = vmul.f32 %v546_v4, %v542_v26 }
 0xe7c   :  { %550 = vrot.lane.b32.xlu1 %v548_v27, %s1016_s9 }
 0xeee   :  { %v551_v28 = vpop.permute.xlu1 %550 }
 0xeef   :  { %v553_v29 = vadd.f32 %v551_v28, %v110_v12 }
 0xef1   :  { %974 = vtanh.f32 %v553_v29 }
 0xef7   :  { %v975_v30 = vpop.eup %974 }
 0xef8   :  { %557 = vrot.lane.b32.xlu2 %v975_v30, %s1017_s1 }
 0xf52   :  { %v558_v32 = vpop.permute.xlu2 %557 }
 0xf53   :  { %v560_v34 = vmul.f32 %v558_v32, %v555_v31 }
 0xf55   :  { %v1195_v35 = vadd.f32 %v561_v33, %v560_v34 }
 0xf57   :  { %564 = vrot.lane.b32.xlu0 %v1195_v35, %s1017_s1 }
 0xfc9   :  { %v565_v36 = vpop.permute.xlu0 %564 }
 0xfca   :  { %895 = vmatmul.msk.f32.vlgmr.msra.gmra.mxu2 %vm116_vm5, %v565_v36 }
0x104d   :  { %v585_v37 = vpop.f32.mrf.mxu2 }
0x104e   :  { %v586_v38 = vadd.f32 %v1100_v7, %v585_v37 }
0x1050   :  { %609 = vrot.lane.b32.xlu1 %v586_v38, %s1016_s9  ;;  %v588_v40 = vadd.f32 %v586_v38, %v113_v39 }
0x1052   :  { %v896_v41 = vmul.f32 -1.442695, %v588_v40 }
0x1054   :  { %976 = vpow2.f32 %v896_v41  ;;  %v911_v41 = vpack.i.bf16 %v705_v18, %v706_v17 }
0x105a   :  { %v977_v42 = vpop.eup %976 }
0x105b   :  { %v592_v43 = vadd.f32 1.0, %v977_v42  ;;  %v916_v42 = vpack.i.bf16 %v703_v20, %v704_v19 }
0x105d   :  { %978 = vrcp.f32 %v592_v43  ;;  %v604_v49 = vand.u32 2147483648, %v592_v43  ;;  %vm598_vm2 = vweird.f32 %v592_v43  ;;  %v602_v7 = vand.u32 2147483647, %v592_v43 }
0x105e   :  { %980 = vrcp.f32 %v657_v60 }
0x105f   :  { %v605_v51 = vor.u32 1.1754944e-38, %v604_v49  ;;  %vm603_vm4 = vcmp.eq.f32.partialorder %v602_v7, 8.507059e+37 }
0x1063   :  { %v979_v44 = vpop.eup %978 }
0x1064   :  { %v594_v45 = vmul.f32 %v979_v44, %v592_v43  ;;  %vm599_vm1 = vweird.f32 %v979_v44  ;;  %v981_v61 = vpop.eup %980 }
0x1065   :  { %vm600_vm3 = vmor %vm598_vm2, %vm599_vm1  ;;  %v660_v62 = vmul.f32 %v981_v61, %v657_v60  ;;  %vm665_vm8 = vweird.f32 %v981_v61 }
0x1066   :  { %v595_v46 = vsub.f32 1.0, %v594_v45  ;;  %vm666_vm9 = vmor %vm664_vm7, %vm665_vm8 }
0x1067   :  { %v661_v6 = vsub.f32 1.0, %v660_v62 }
0x1068   :  { %v596_v47 = vmul.f32 %v979_v44, %v595_v46 }
0x1069   :  { %v662_v9 = vmul.f32 %v981_v61, %v661_v6 }
0x106a   :  { %v597_v48 = vadd.f32 %v979_v44, %v596_v47 }
0x106b   :  { %v663_v1 = vadd.f32 %v981_v61, %v662_v9 }
0x106c   :  { %v601_v50 = vsel %vm600_vm3, %v979_v44, %v597_v48 }
0x106d   :  { %v1204_v5 = vsel %vm603_vm4, %v605_v51, %v601_v50  ;;  %v667_v11 = vsel %vm666_vm9, %v981_v61, %v663_v1 }
0x106e   :  { %v672_v12 = vsel %vm669_vm10, %v671_v0, %v667_v11  ;;  %v619_v32 = vsub.f32 1.0, %v1204_v5  ;;  %v625_v34 = vmul.f32 %v1204_v5, %v1195_v35  ;;  %v933_v35 = vld [vmem:[#allocation2 + $0x20] ss:$0 sm:$0xff] }
0x106f   :  { %v674_v14 = vsel %vm658_vm11, %v672_v12, 0.0 }
0x1070   :  { %v676_v15 = vmul.f32 %v674_v14, %v630_v53 }
0x1072   :  { %897 = vmatpush.xpose.msk.msrb.mxu3 %vm631_vm6, %v676_v15 }
0x107a   :  { %633 = vadd.xlane.f32.xlu1 %v632_v54 }
0x10c2   :  { %v610_v10 = vpop.permute.xlu1 %609 }
0x10c3   :  { %v612_v52 = vmul.f32 %v610_v10, %v1204_v5 }
0x10c5   :  { %614 = vrot.lane.b32.xlu2 %v612_v52, %s1016_s9 }
0x10ed   :  { %v634_v16 = vpop.xlane.xlu1 %633 }
0x10ee   :  { %v647_v23 = vand.u32 2147483648, %v634_v16  ;;  %vm641_vm12 = vweird.f32 %v634_v16  ;;  %v645_v25 = vand.u32 2147483647, %v634_v16  ;;  %vm635_vm1 = vcmp.gt.f32.partialorder %v634_v16, 0.0 }
0x10f0   :  { %v648_v26 = vor.u32 1.1754944e-38, %v647_v23  ;;  %vm646_vm15 = vcmp.eq.f32.partialorder %v645_v25, 8.507059e+37 }
0x111f   :  { %v615_v63 = vpop.permute.xlu2 %614 }
0x1120   :  { %v617_v3 = vadd.f32 %v615_v63, %v113_v39 }
0x1122   :  { %982 = vtanh.f32 %v617_v3 }
0x1123   :  { %984 = vrcp.f32 %v634_v16 }
0x1128   :  { %v983_v13 = vpop.eup %982 }
0x1129   :  { %621 = vrot.lane.b32.xlu0 %v983_v13, %s1017_s1  ;;  %v985_v21 = vpop.eup %984 }
0x112a   :  { %v637_v22 = vmul.f32 %v985_v21, %v634_v16  ;;  %vm642_vm13 = vweird.f32 %v985_v21 }
0x112b   :  { %vm643_vm14 = vmor %vm641_vm12, %vm642_vm13 }
0x112c   :  { %v638_v24 = vsub.f32 1.0, %v637_v22 }
0x112e   :  { %v639_v4 = vmul.f32 %v985_v21, %v638_v24 }
0x1130   :  { %v640_v27 = vadd.f32 %v985_v21, %v639_v4 }
0x1131   :  { %912 = vrot.lane.b32.xlu0 %v911_v41, %s1017_s1 }
0x1132   :  { %v644_v28 = vsel %vm643_vm14, %v985_v21, %v640_v27 }
0x1133   :  { %v649_v29 = vsel %vm646_vm15, %v648_v26, %v644_v28 }
0x1134   :  { %v651_v30 = vsel %vm635_vm1, %v649_v29, 0.0 }
0x1135   :  { %v675_v31 = vmul.f32 %v651_v30, %v630_v53 }
0x1137   :  { %898 = vmatmul.msk.f32.vlgmr.msrb.gmra.mxu3 %vm631_vm6, %v675_v31  ;;  %vm867_vm6 = vcmask 31744  }
0x1139   :  { %922 = vrot.lane.b32.xlu0 %v911_v41, %s1016_s9 }
0x1141   :  { %927 = vrot.lane.b32.xlu0 %v916_v42, %s1016_s9 }
0x119b   :  { %v622_v33 = vpop.permute.xlu0 %621 }
0x119c   :  { %v624_v36 = vmul.f32 %v622_v33, %v619_v32 }
0x119e   :  { %v626_v37 = vadd.f32 %v625_v34, %v624_v36 }
0x11a0   :  { %vm627_vm2 = vcmp.ge.f32.partialorder %v626_v37, 0.0  ;;  %v628_v38 = vmul.f32 0.01, %v626_v37 }
0x11a2   :  { %v629_v39 = vsel %vm627_vm2, %v626_v37, %v628_v38 }
0x11a3   :  { %709 = vrot.lane.b32.xlu2 %v629_v39, %s1017_s1  ;;  %v913_v45 = vpop.permute.xlu0 %912 }
0x11a4   :  { %v915_v47 = vunpack.i.h.bf16 %v913_v45  ;;  %v914_v48 = vunpack.i.l.bf16 %v913_v45 }
0x11a6   :  { %791 = vmatpush.msra.mxu3 %v914_v48 }
0x11a8   :  { %792 = vmatpush.msra.mxu3 %v915_v47 }
0x11ab   :  { %917 = vrot.lane.b32.xlu2 %v916_v42, %s1017_s1  ;;  %v923_v53 = vpop.permute.xlu0 %922 }
0x11ac   :  { %v925_v54 = vunpack.i.h.bf16 %v923_v53  ;;  %v924_v55 = vunpack.i.l.bf16 %v923_v53 }
0x11b3   :  { %800 = vrot.lane.b32.xlu2 %v933_v35, %s1017_s1  ;;  %v928_v56 = vpop.permute.xlu0 %927 }
0x11b4   :  { %v930_v57 = vunpack.i.h.bf16 %v928_v56  ;;  %v929_v58 = vunpack.i.l.bf16 %v928_v56 }
0x11ba   :  { %v700_v44 = vpop.f32.mrf.mxu3 }
0x11bb   :  { %838 = vrot.lane.b32.xlu2 %v933_v35, %s1016_s9 }
0x11fd   :  { %v710_v40 = vpop.permute.xlu2 %709 }
0x11fe   :  { %899 = vmatmul.msk.f32.vlgmr.msrb.gmra.mxu1 %vm116_vm5, %v710_v40 }
0x1205   :  { %v918_v46 = vpop.permute.xlu2 %917 }
0x1206   :  { %v919_v49 = vunpack.i.l.bf16 %v918_v46  ;;  %v920_v7 = vunpack.i.h.bf16 %v918_v46 }
0x1208   :  { %793 = vmatpush.msra.mxu3 %v919_v49 }
0x120a   :  { %794 = vmatpush.msra.mxu3 %v920_v7 }
0x120d   :  { %v801_v59 = vpop.permute.xlu2 %800 }
0x1215   :  { %v839_v2 = vpop.permute.xlu2 %838 }
0x127b   :  { %v730_v43 = vpop.f32.mrf.mxu1 }
0x127c   :  { %752 = vmatpush.msrb.mxu2 %v730_v43 }
0x127d   :  { %900 = vmatmul.msk.f32.vlgmr.msrb.gmra.mxu2 %vm49_vm0, %v700_v44 }
0x127e   :  { %856 = vmatpush.msra.mxu2 %v924_v55 }
0x1280   :  { %857 = vmatpush.msra.mxu2 %v925_v54 }
0x1282   :  { %858 = vmatpush.msra.mxu2 %v929_v58 }
0x1284   :  { %859 = vmatpush.msra.mxu2 %v930_v57 }
0x1300   :  { %v754_v50 = vpop.f32.mrf.mxu2 }
0x1301   :  { %v755_v51 = vadd.f32 %v933_v35, %v754_v50 }
0x1303   :  { %vm757_vm3 = vcmp.ge.f32.partialorder %v755_v51, 0.0  ;;  %v758_v10 = vmul.f32 0.2, %v755_v51 }
0x1305   :  { %v759_v5 = vsel %vm757_vm3, %v755_v51, %v758_v10 }
0x1306   :  { %901 = vmatmul.msk.f32.vlgmr.msra.gmra.mxu3 %vm116_vm5, %v759_v5 }
0x1389   :  { %v796_v52 = vpop.f32.mrf.mxu3 }
0x138a   :  { %818 = vmatpush.msra.mxu1 %v796_v52 }
0x138b   :  { %902 = vmatmul.msk.f32.vlgmr.msra.gmra.mxu1 %vm49_vm0, %v700_v44 }
0x1408   :  { %v820_v60 = vpop.f32.mrf.mxu1 }
0x1409   :  { %v821_v61 = vadd.f32 %v820_v60, %v801_v59 }
0x140b   :  { %vm823_vm4 = vcmp.ge.f32.partialorder %v821_v61, 0.0  ;;  %v824_v62 = vmul.f32 0.2, %v821_v61 }
0x140d   :  { %v825_v63 = vsel %vm823_vm4, %v821_v61, %v824_v62 }
0x140e   :  { %903 = vmatmul.msk.f32.vlgmr.msra.gmra.mxu2 %vm116_vm5, %v825_v63 }
0x1491   :  { %v861_v3 = vpop.f32.mrf.mxu2 }
0x1492   :  { %v862_v6 = vadd.f32 %v861_v3, %v839_v2 }
0x1494   :  { %vm864_vm0 = vcmp.ge.f32.partialorder %v862_v6, 0.0  ;;  %v865_v8 = vmul.f32 0.01, %v862_v6 }
0x1496   :  { %v866_v9 = vsel %vm864_vm0, %v862_v6, %v865_v8 }
0x1497   :  { %868 = vst.msk [vmem:[%s1237_s4] sm:$0xff] %vm867_vm6, %v866_v9 }
0x1498   :  { %873 = vsyncpa [#allocation3], 1 }

</bundles_post_ra>
